<compile_context>
chip_gen: v7x
topology: tpu7x:2x2x1
jax: 0.10.0
libtpu: 0.0.40
codegen_flags: <defaults>
</compile_context>

<pallas_src>
import functools

import jax
import jax.numpy as jnp
from jax import lax
from jax.experimental import pallas as pl
from jax.experimental.pallas import tpu as pltpu


def _round_up(x, m):
    return ((x + m - 1) // m) * m


def _linear_sub_kernel(x_ref, w_ref, bv_ref, o_ref, acc_ref):
    # x_ref: (tm, tk), w_ref: (tn, tk), bv_ref: (1, tn), o_ref: (tm, tn)
    k = pl.program_id(2)

    @pl.when(k == 0)
    def _():
        acc_ref[...] = jnp.zeros_like(acc_ref)

    # Contract against the untransposed weight tile: (tm, tk) . (tn, tk)^T
    acc_ref[...] += lax.dot_general(
        x_ref[...],
        w_ref[...],
        dimension_numbers=(((1,), (1,)), ((), ())),
        preferred_element_type=jnp.float32,
    )

    @pl.when(k == pl.num_programs(2) - 1)
    def _():
        # Fused (bias - other) added exactly once per output tile.
        o_ref[...] = (acc_ref[...] + bv_ref[...]).astype(o_ref.dtype)


@functools.partial(jax.jit, static_argnames=("tm", "tn", "tk"))
def linear_sub(x2d, weight, fused_bias, *, tm=256, tn=256, tk=512):
    """x2d: (M, K) f32, weight: (N, K) f32, fused_bias: (1, N) -> (M, N)."""
    M, K = x2d.shape
    N, Kw = weight.shape
    assert K == Kw

    # Adapt tile sizes to small problems while respecting the (8, 128) rule.
    tm = min(tm, _round_up(M, 8))
    tn = min(tn, _round_up(N, 128))
    tk = min(tk, _round_up(K, 128))

    Mp = _round_up(M, tm)
    Np = _round_up(N, tn)
    Kp = _round_up(K, tk)

    if (Mp, Kp) != (M, K):
        x2d = jnp.pad(x2d, ((0, Mp - M), (0, Kp - K)))
    if (Np, Kp) != (N, K):
        weight = jnp.pad(weight, ((0, Np - N), (0, Kp - K)))
    if Np != N:
        fused_bias = jnp.pad(fused_bias, ((0, 0), (0, Np - N)))

    grid = (Mp // tm, Np // tn, Kp // tk)

    itemsize = jnp.dtype(x2d.dtype).itemsize
    cost = pl.CostEstimate(
        flops=2 * Mp * Np * Kp,
        transcendentals=0,
        bytes_accessed=(Mp * Kp + Np * Kp + Np + Mp * Np) * itemsize,
    )

    out = pl.pallas_call(
        _linear_sub_kernel,
        out_shape=jax.ShapeDtypeStruct((Mp, Np), x2d.dtype),
        grid_spec=pltpu.PrefetchScalarGridSpec(
            num_scalar_prefetch=0,
            grid=grid,
            in_specs=[
                pl.BlockSpec((tm, tk), lambda i, j, k: (i, k)),   # x tile
                pl.BlockSpec((tn, tk), lambda i, j, k: (j, k)),   # weight tile (N,K)
                pl.BlockSpec((1, tn), lambda i, j, k: (0, j)),    # fused bias row
            ],
            out_specs=pl.BlockSpec((tm, tn), lambda i, j, k: (i, j)),
            scratch_shapes=[pltpu.VMEM((tm, tn), jnp.float32)],
        ),
        compiler_params=pltpu.CompilerParams(
            dimension_semantics=("parallel", "parallel", "arbitrary"),
            vmem_limit_bytes=32 * 1024 * 1024,
        ),
        cost_estimate=cost,
    )(x2d, weight, fused_bias)

    return out[:M, :N]


def model_forward(x, weight, bias, other):
    """x: (B, S, in_features); weight: (out_features, in_features);
    bias: (out_features,); other: (out_features,) broadcastable."""
    B, S, K = x.shape
    N = weight.shape[0]
    x2d = x.reshape(B * S, K)
    fused = (bias - other).reshape(1, N)          # pre-fuse bias and `other`
    out2d = linear_sub(x2d, weight, fused)
    return out2d.reshape(B, S, N)


if __name__ == "__main__":
    key = jax.random.PRNGKey(0)
    k_x, k_w, k_b, k_o = jax.random.split(key, 4)

    B, S, IN, OUT = 2, 8, 32, 32
    x = jax.random.normal(k_x, (B, S, IN), dtype=jnp.float32)
    weight = jax.random.normal(k_w, (OUT, IN), dtype=jnp.float32) * 0.1
    bias = jax.random.normal(k_b, (OUT,), dtype=jnp.float32) * 0.1
    other = jax.random.normal(k_o, (OUT,), dtype=jnp.float32)

    out = model_forward(x, weight, bias, other)
    jax.block_until_ready(out)

    # Sanity check against pure-JAX reference.
    ref = (x @ weight.T + bias) - other
    assert out.shape == (B, S, OUT)
    assert jnp.allclose(out, ref, atol=1e-4, rtol=1e-4)

    print("KERNEL_OK")
</pallas_src>

<mosaic_0001>
module attributes {stable_mosaic.version = 11 : i64} {
  func.func @_linear_sub_kernel(%arg0: i32, %arg1: i32, %arg2: i32, %arg3: memref<16x128xf32, #tpu.memory_space<vmem>>, %arg4: memref<128x128xf32, #tpu.memory_space<vmem>>, %arg5: memref<1x128xf32, #tpu.memory_space<vmem>>, %arg6: memref<16x128xf32, #tpu.memory_space<vmem>>, %arg7: memref<16x128xf32, #tpu.memory_space<vmem>>) attributes {dimension_semantics = [#tpu.dimension_semantics<parallel>, #tpu.dimension_semantics<parallel>, #tpu.dimension_semantics<arbitrary>], iteration_bounds = array<i64: 1, 1, 1>, scalar_prefetch = 0 : i64, scratch_operands = 1 : i64, tpu.core_type = #tpu.core_type<tc>, window_params = [{transform_indices = @transform_0, window_bounds = array<i64: 16, 128>}, {transform_indices = @transform_1, window_bounds = array<i64: 128, 128>}, {transform_indices = @transform_2, window_bounds = array<i64: 1, 128>}, {transform_indices = @transform_3, window_bounds = array<i64: 16, 128>}]} {
    %c0_i32 = arith.constant 0 : i32
    %0 = arith.cmpi eq, %arg2, %c0_i32 : i32
    %1 = arith.extui %0 : i1 to i32
    %c0_i32_0 = arith.constant 0 : i32
    %2 = arith.cmpi ne, %1, %c0_i32_0 : i32
    scf.if %2 {
      %cst_10 = arith.constant 0.000000e+00 : f32
      %12 = vector.broadcast %cst_10 : f32 to vector<16x128xf32>
      %c0_11 = arith.constant 0 : index
      %c0_12 = arith.constant 0 : index
      %13 = vector.load %arg7[%c0_11, %c0_12] : memref<16x128xf32, #tpu.memory_space<vmem>>, vector<16x128xf32>
      tpu.vector_store %arg7[%c0_11, %c0_12], %12 {strides = array<i32>} : memref<16x128xf32, #tpu.memory_space<vmem>>, vector<16x128xf32>,
    } else {
    }
    %c0 = arith.constant 0 : index
    %c0_1 = arith.constant 0 : index
    %3 = vector.load %arg7[%c0, %c0_1] : memref<16x128xf32, #tpu.memory_space<vmem>>, vector<16x128xf32>
    %c0_2 = arith.constant 0 : index
    %c0_3 = arith.constant 0 : index
    %4 = vector.load %arg3[%c0_2, %c0_3] : memref<16x128xf32, #tpu.memory_space<vmem>>, vector<16x128xf32>
    %c0_4 = arith.constant 0 : index
    %c0_5 = arith.constant 0 : index
    %5 = vector.load %arg4[%c0_4, %c0_5] : memref<128x128xf32, #tpu.memory_space<vmem>>, vector<128x128xf32>
    %cst = arith.constant dense<0.000000e+00> : vector<16x128xf32>
    %6 = tpu.matmul %4, %5, %cst {dimension_numbers = #tpu.dot_dimension_numbers<[1], [1], [0], [0], [0, 0, 1, 0], [], []>} : vector<16x128xf32>, vector<128x128xf32>, vector<16x128xf32> -> vector<16x128xf32>
    %7 = arith.addf %3, %6 : vector<16x128xf32>
    %c0_6 = arith.constant 0 : index
    %c0_7 = arith.constant 0 : index
    %8 = vector.load %arg7[%c0_6, %c0_7] : memref<16x128xf32, #tpu.memory_space<vmem>>, vector<16x128xf32>
    tpu.vector_store %arg7[%c0_6, %c0_7], %7 {strides = array<i32>} : memref<16x128xf32, #tpu.memory_space<vmem>>, vector<16x128xf32>,
    %c0_i32_8 = arith.constant 0 : i32
    %9 = arith.cmpi eq, %arg2, %c0_i32_8 : i32
    %10 = arith.extui %9 : i1 to i32
    %c0_i32_9 = arith.constant 0 : i32
    %11 = arith.cmpi ne, %10, %c0_i32_9 : i32
    scf.if %11 {
      %c0_10 = arith.constant 0 : index
      %c0_11 = arith.constant 0 : index
      %12 = vector.load %arg7[%c0_10, %c0_11] : memref<16x128xf32, #tpu.memory_space<vmem>>, vector<16x128xf32>
      %c0_12 = arith.constant 0 : index
      %c0_13 = arith.constant 0 : index
      %13 = vector.load %arg5[%c0_12, %c0_13] : memref<1x128xf32, #tpu.memory_space<vmem>>, vector<1x128xf32>
      %14 = vector.broadcast %13 : vector<1x128xf32> to vector<16x128xf32>
      %15 = arith.addf %12, %14 : vector<16x128xf32>
      %c0_14 = arith.constant 0 : index
      %c0_15 = arith.constant 0 : index
      %16 = vector.load %arg6[%c0_14, %c0_15] : memref<16x128xf32, #tpu.memory_space<vmem>>, vector<16x128xf32>
      tpu.vector_store %arg6[%c0_14, %c0_15], %15 {strides = array<i32>} : memref<16x128xf32, #tpu.memory_space<vmem>>, vector<16x128xf32>,
    } else {
    }
    return
  }
  func.func @transform_0(%arg0: i32, %arg1: i32, %arg2: i32) -> (i32, i32) {
    %c0_i32 = arith.constant 0 : i32
    return %arg0, %arg2 : i32, i32
  }
  func.func @transform_1(%arg0: i32, %arg1: i32, %arg2: i32) -> (i32, i32) {
    %c0_i32 = arith.constant 0 : i32
    return %arg1, %arg2 : i32, i32
  }
  func.func @transform_2(%arg0: i32, %arg1: i32, %arg2: i32) -> (i32, i32) {
    %c0_i32 = arith.constant 0 : i32
    %c0_i32_0 = arith.constant 0 : i32
    return %c0_i32, %arg1 : i32, i32
  }
  func.func @transform_3(%arg0: i32, %arg1: i32, %arg2: i32) -> (i32, i32) {
    %c0_i32 = arith.constant 0 : i32
    return %arg0, %arg1 : i32, i32
  }
}

</mosaic_0001>

<bundles_post_ra>
// kernel: linear_sub.1
= control target key start
LH: loop header
LB: loop body
LE: loop exit
PB: predicated region body
PF: predicated region fallthrough
CT: control target
= control target key end

     0   :  { %s357_s0 = inlined_call_operand.vmem [shape: f32[16,128], index: 0, kind: input, shape index: {}]   ;;  %s358_s1 = inlined_call_operand.vmem [shape: f32[128,128], index: 1, kind: input, shape index: {}]   ;;  %s359_s2 = inlined_call_operand.vmem [shape: f32[1,128], index: 2, kind: input, shape index: {}]   ;;  %s360_s3 = inlined_call_operand.hbm [shape: f32[16,128], index: 3, kind: output, shape index: {}]  }
   0x1   :  { %v25_v0 = vld [vmem:[%s358_s1] sm:$0xff]  ;;  %v26_v1 = vld [vmem:[%s358_s1 + $0x8] sm:$0xff]  ;;  %v27_v2 = vld [vmem:[%s358_s1 + $0x10] sm:$0xff] }
   0x2   :  { %v206_v3 = vpack.c.bf16 %v26_v1, %v25_v0  ;;  %v28_v4 = vld [vmem:[%s358_s1 + $0x18] sm:$0xff]  ;;  %v23_v6 = vld [vmem:[%s357_s0] sm:$0xff]  ;;  %v30_v8 = vld [vmem:[%s358_s1 + $0x28] sm:$0xff] }
   0x3   :  { %v210_v5 = vpack.c.bf16 %v28_v4, %v27_v2  ;;  %v29_v7 = vld [vmem:[%s358_s1 + $0x20] sm:$0xff]  ;;  %203 = vmatprep.mubr.f32.mxu0 %v23_v6 }
   0x4   :  { %207 = vmatprep.subr.bf16.mxu0 %v206_v3 }
   0x5   :  { %209 = vmatpush3.bf16.xpose.msra.mxu0 %v206_v3 }
   0x6   :  { %211 = vmatprep.subr.bf16.mxu0 %v210_v5 }
   0x7   :  { %8 = vsyncpa [#allocation4], 0  ;;  %v214_v9 = vpack.c.bf16 %v30_v8, %v29_v7  ;;  %v31_v10 = vld [vmem:[%s358_s1 + $0x30] sm:$0xff]  ;;  %v32_v11 = vld [vmem:[%s358_s1 + $0x38] sm:$0xff]  ;;  %s265_s23 = smov [#allocation3]  }
   0x8   :  { %v218_v12 = vpack.c.bf16 %v32_v11, %v31_v10  ;;  %v33_v13 = vld [vmem:[%s358_s1 + $0x40] sm:$0xff]  ;;  %v34_v14 = vld [vmem:[%s358_s1 + $0x48] sm:$0xff]  ;;  %v35_v16 = vld [vmem:[%s358_s1 + $0x50] sm:$0xff]  ;;  %s141_s24 = sshll.u32 %s265_s23, 4  ;;  %s142_s24 = int_to_ptr.vmem [resolvable:$true] %s141_s24 }
   0x9   :  { %v222_v15 = vpack.c.bf16 %v34_v14, %v33_v13  ;;  %v36_v17 = vld [vmem:[%s358_s1 + $0x58] sm:$0xff]  ;;  %v37_v19 = vld [vmem:[%s358_s1 + $0x60] sm:$0xff]  ;;  %v38_v20 = vld [vmem:[%s358_s1 + $0x68] sm:$0xff]  ;;  %p246_p1 = scmp.lt.s32.totalorder %s142_s24, %s142_s24 }
   0xa   :  { %v226_v18 = vpack.c.bf16 %v36_v17, %v35_v16  ;;  %v230_v21 = vpack.c.bf16 %v38_v20, %v37_v19  ;;  %v39_v22 = vld [vmem:[%s358_s1 + $0x70] sm:$0xff]  ;;  %v40_v23 = vld [vmem:[%s358_s1 + $0x78] sm:$0xff]  ;;  %v24_v25 = vld [vmem:[%s357_s0 + $0x8] sm:$0xff]  ;;  %s241_s1 = scalar_lea.vmem %s142_s24, 256 }
   0xb   :  { %v234_v24 = vpack.c.bf16 %v40_v23, %v39_v22  ;;  %v152_v26 = vld [vmem:[%s359_s2] ss:$0 sm:$0xff]  ;;  %p242_p0 = scmp.ne.s32.totalorder %s142_s24, %s241_s1  ;;  %p247_p2 = scmp.lt.s32.totalorder %s241_s1, %s241_s1 }
   0xd   :  { %213 = vmatpush3.bf16.xpose.msra.mxu0 %v210_v5  ;;  %p248_p3 = por %p247_p2, %p246_p1 }
   0xe   :  { %215 = vmatprep.subr.bf16.mxu0 %v214_v9 }
   0xf   :  { %p249_p4 = pnand %p248_p3, %p242_p0 }
  0x15   :  { %217 = vmatpush3.bf16.xpose.msra.mxu0 %v214_v9 }
  0x16   :  { %219 = vmatprep.subr.bf16.mxu0 %v218_v12 }
  0x1d   :  { %221 = vmatpush3.bf16.xpose.msra.mxu0 %v218_v12 }
  0x1e   :  { %223 = vmatprep.subr.bf16.mxu0 %v222_v15 }
  0x25   :  { %225 = vmatpush3.bf16.xpose.msra.mxu0 %v222_v15 }
  0x26   :  { %227 = vmatprep.subr.bf16.mxu0 %v226_v18 }
  0x2d   :  { %229 = vmatpush3.bf16.xpose.msra.mxu0 %v226_v18 }
  0x2e   :  { %231 = vmatprep.subr.bf16.mxu0 %v230_v21 }
  0x35   :  { %233 = vmatpush3.bf16.xpose.msra.mxu0 %v230_v21 }
  0x36   :  { %235 = vmatprep.subr.bf16.mxu0 %v234_v24 }
  0x3d   :  { %237 = vmatpush3.bf16.xpose.msra.mxu0 %v234_v24 }
  0x44   :  { %204 = vmatmul.mubr.f32.vlgmr.msra.gmra.mrb[0].mxu0 %v24_v25 }
 0x117   :  { %v205_v27 = vpop.f32.mrb[0].mxu0 }
 0x118   :  { %v133_v28 = vadd.f32 %v205_v27, %v152_v26  ;;  %v107_v29 = vpop.f32.mrb[1].mxu0 }
 0x119   :  { %v132_v30 = vadd.f32 %v152_v26, %v107_v29 }
 0x11a   :  { %135 = vst [vmem:[#allocation3 + $0x8] sm:$0xff] %v133_v28 }
 0x11b   :  { %134 = vst [vmem:[#allocation3] sm:$0xff] %v132_v30 }
 0x11c   :  { %252 = shalt.err (!%p249_p4)
}
 0x11d   :  { %s253_s2 = scalar_lea.hbm %s360_s3, 256 }
 0x11e   :  { %p254_p5 = scmp.ne.s32.totalorder %s360_s3, %s253_s2  ;;  %p257_p6 = scmp.lt.u32.totalorder %s253_s2, %s360_s3 }
 0x120   :  { %p259_p7 = pnand %p257_p6, %p254_p5 }
 0x122   :  { %262 = shalt.err (!%p259_p7)
}
 0x123   :  { %s266_s30 = smov 128   ;;  %s267_s4 = smov 8  }
 0x124   :  { %147 = dma.vmem_to_hbm [thread:$0]  %s142_s24, 256, %s360_s3, [#allocation4], %s266_s30, %s266_s30, %s267_s4  }
 0x125   :  { %263 = dma.done.wait [#allocation4], 256  }
 0x126   :  { %264 = vsyncadd [#allocation4], 4294967040 }
 0x127   :  { %151 = vsyncpa [#allocation4], 1 }

</bundles_post_ra>
